<compile_context>
chip_gen: v7x
topology: tpu7x:2x2x1
jax: 0.10.0
libtpu: 0.0.40
codegen_flags: <defaults>
</compile_context>

<pallas_src>
import jax
import jax.numpy as jnp
from jax.experimental import pallas as pl
from jax.experimental.pallas import tpu as pltpu

L = 16        # lrp_length
IN_DIM = 2    # lrp_in_dim (== lrp_e_dim)
C = 128       # lrp_out_dim
HID = 2 * C   # degnet hidden width


# ---------------- fused Pallas kernel ----------------

def lrp_fused_kernel(a_ref, feat_ref, w0t_ref, w1t_ref, bias_ref, pool_ref,
                     degs_ref, d0w_ref, d0b_ref, d1w_ref, d1b_ref, out_ref):
    m_total = feat_ref.shape[0]                 # N_NODES + N_EDGES (static)

    # --- fold the feature matmul into the LRP weights (VPU broadcast MAC) ---
    f0 = feat_ref[:, 0:1]                       # (M, 1)  static slices: free
    f1 = feat_ref[:, 1:2]                       # (M, 1)
    # G[a, m, c] = F[m,0]*weights[0,c,a] + F[m,1]*weights[1,c,a]
    g = (w0t_ref[...][:, None, :] * f0[None, :, :]
         + w1t_ref[...][:, None, :] * f1[None, :, :])           # (L, M, C)
    # 8-aligned merge of the leading dim into the sublane dim (layout-preserving: M % 8 == 0)
    g = g.reshape(L * m_total, C)                               # (L*M, C)

    # --- one deep-K MXU matmul: (D, L*M) @ (L*M, C) -> (D, C) ---
    h = jnp.dot(a_ref[...], g, preferred_element_type=jnp.float32)
    h = jnp.maximum(h + bias_ref[...], 0.0)

    # --- pooling (dense stand-in for torch.sparse mm): (N, D) @ (D, C) ---
    h = jnp.dot(pool_ref[...], h, preferred_element_type=jnp.float32)

    # --- degnet_0 (Linear(1, 2C)) as a VPU broadcast, degnet_1 on the MXU ---
    z = jnp.maximum(degs_ref[...] * d0w_ref[...] + d0b_ref[...], 0.0)                   # (N, 2C)
    fdeg = jnp.dot(z, d1w_ref[...], preferred_element_type=jnp.float32) + d1b_ref[...]  # (N, C)

    # --- elementwise gate + relu; lane-dense (N, C) output, unmasked stores ---
    out_ref[...] = jnp.maximum(h * fdeg, 0.0)


# ---------------- one-time parameter re-layout (hoisted out of forward) ----------------

def prepare_params(weights, bias, W0, b0, W1, b1):
    return dict(
        w0t=jnp.asarray(weights[0].T),        # (L, C): w0t[a, c] = weights[0, c, a]
        w1t=jnp.asarray(weights[1].T),        # (L, C)
        bias=jnp.asarray(bias),               # (1, C)
        d0w=jnp.asarray(W0.T),                # (1, 2C)
        d0b=jnp.asarray(b0).reshape(1, HID),  # (1, 2C)
        d1w=jnp.asarray(W1.T),                # (2C, C)
        d1b=jnp.asarray(b1).reshape(1, C),    # (1, C)
    )


# ---------------- forward wrapper (single pallas_call) ----------------

def lrp_synthetic_forward(nfeat, efeat, n2p, e2p, pool, degs, params):
    P = n2p.shape[0]
    D = P // L
    M = nfeat.shape[0] + efeat.shape[0]
    N = pool.shape[0]

    # Data glue (tiny, fused by XLA): fold the two "sparse" perm matrices into one
    # lane-dense operand.  A_fold[d, a*M + m] = [n2p | e2p][d*L + a, m].
    a_fold = jnp.concatenate([n2p, e2p], axis=1).reshape(D, L * M)   # (D, L*M)
    feat = jnp.concatenate([nfeat, efeat], axis=0)                   # (M, IN_DIM)
    degs_col = degs.reshape(N, 1)

    vmem = pl.BlockSpec(memory_space=pltpu.MemorySpace.VMEM)
    # TODO(synk): for a batch of graphs (esp. v7x with 2 TCs/chip), add a leading
    # "parallel" grid axis over the batch; a single graph is launch-latency bound.
    return pl.pallas_call(
        lrp_fused_kernel,
        out_shape=jax.ShapeDtypeStruct((N, C), jnp.float32),
        in_specs=[vmem] * 11,
        out_specs=vmem,
    )(a_fold, feat, params["w0t"], params["w1t"], params["bias"], pool,
      degs_col, params["d0w"], params["d0b"], params["d1w"], params["d1b"])


# ---------------- pure-JAX reference (mirrors the PyTorch forward) ----------------

def reference(nfeat, efeat, n2p, e2p, pool, degs, weights, bias, W0, b0, W1, b1):
    perm = n2p @ nfeat + e2p @ efeat
    x = perm.T.reshape(IN_DIM, -1, L).transpose(1, 2, 0)          # (D, L, IN_DIM)
    h = jax.nn.relu(jnp.einsum('dab,bca->dc', x, weights) + bias)
    h = pool @ h
    z = jax.nn.relu(degs[:, None] @ W0.T + b0)
    f = z @ W1.T + b1
    return jax.nn.relu(h * f)


if __name__ == "__main__":
    key = jax.random.PRNGKey(0)
    ks = jax.random.split(key, 11)

    N_NODES, N_EDGES, D = 8, 16, 8
    P = D * L  # 128  (perm length; must be a multiple of lrp_length)

    # graph data
    nfeat = jax.random.normal(ks[0], (N_NODES, IN_DIM), jnp.float32)   # graph.ndata['h']
    efeat = jax.random.normal(ks[1], (N_EDGES, IN_DIM), jnp.float32)   # graph.edata['feat']

    # dense stand-ins for the torch.sparse matrices
    n2p = (jax.random.uniform(ks[2], (P, N_NODES)) < 0.2).astype(jnp.float32)
    e2p = (jax.random.uniform(ks[3], (P, N_EDGES)) < 0.2).astype(jnp.float32)
    pool = (jax.random.uniform(ks[4], (N_NODES, D)) < 0.3).astype(jnp.float32)
    degs = jax.random.uniform(ks[5], (N_NODES,), jnp.float32, 1.0, 5.0)

    # deterministic parameter init (shapes from LRP_synthetic_layer.__init__)
    weights = jax.random.normal(ks[6], (IN_DIM, C, L), jnp.float32)    # nn.Parameter randn
    bias = jnp.zeros((1, C), jnp.float32)
    W0 = jax.random.uniform(ks[7], (HID, 1), jnp.float32, -1.0, 1.0)   # Linear(1, 2C)
    b0 = jax.random.uniform(ks[8], (HID,), jnp.float32, -1.0, 1.0)
    lim1 = 1.0 / float(jnp.sqrt(HID))
    W1 = jax.random.uniform(ks[9], (C, HID), jnp.float32, -lim1, lim1)  # Linear(2C, C)
    b1 = jax.random.uniform(ks[10], (C,), jnp.float32, -lim1, lim1)

    params = prepare_params(weights, bias, W0, b0, W1, b1)   # one-time relayout

    fwd = jax.jit(lrp_synthetic_forward)
    out = jax.block_until_ready(fwd(nfeat, efeat, n2p, e2p, pool, degs, params))

    ref = reference(nfeat, efeat, n2p, e2p, pool, degs,
                    weights, bias, W0, b0, W1, b1)

    assert out.shape == (N_NODES, C), out.shape
    max_err = float(jnp.max(jnp.abs(out - ref)))
    assert jnp.allclose(out, ref, rtol=1e-4, atol=1e-3), max_err
    print("KERNEL_OK")
</pallas_src>

<mosaic_0001>
module attributes {stable_mosaic.version = 11 : i64} {
  func.func @lrp_fused_kernel(%arg0: memref<8x384xf32, #tpu.memory_space<vmem>>, %arg1: memref<24x2xf32, #tpu.memory_space<vmem>>, %arg2: memref<16x128xf32, #tpu.memory_space<vmem>>, %arg3: memref<16x128xf32, #tpu.memory_space<vmem>>, %arg4: memref<1x128xf32, #tpu.memory_space<vmem>>, %arg5: memref<8x8xf32, #tpu.memory_space<vmem>>, %arg6: memref<8x1xf32, #tpu.memory_space<vmem>>, %arg7: memref<1x256xf32, #tpu.memory_space<vmem>>, %arg8: memref<1x256xf32, #tpu.memory_space<vmem>>, %arg9: memref<256x128xf32, #tpu.memory_space<vmem>>, %arg10: memref<1x128xf32, #tpu.memory_space<vmem>>, %arg11: memref<8x128xf32, #tpu.memory_space<vmem>>) attributes {dimension_semantics = [], scalar_prefetch = 0 : i64, scratch_operands = 0 : i64, tpu.core_type = #tpu.core_type<tc>} {
    %c0 = arith.constant 0 : index
    %c0_0 = arith.constant 0 : index
    %0 = vector.load %arg1[%c0, %c0_0] : memref<24x2xf32, #tpu.memory_space<vmem>>, vector<24x1xf32>
    %c0_1 = arith.constant 0 : index
    %c1 = arith.constant 1 : index
    %1 = vector.load %arg1[%c0_1, %c1] : memref<24x2xf32, #tpu.memory_space<vmem>>, vector<24x1xf32>
    %c0_2 = arith.constant 0 : index
    %c0_3 = arith.constant 0 : index
    %2 = vector.load %arg2[%c0_2, %c0_3] : memref<16x128xf32, #tpu.memory_space<vmem>>, vector<16x128xf32>
    %3 = vector.shape_cast %2 : vector<16x128xf32> to vector<16x1x128xf32>
    %4 = vector.shape_cast %0 : vector<24x1xf32> to vector<1x24x1xf32>
    %5 = vector.broadcast %3 : vector<16x1x128xf32> to vector<16x24x128xf32>
    %6 = vector.broadcast %4 : vector<1x24x1xf32> to vector<16x24x128xf32>
    %7 = arith.mulf %5, %6 : vector<16x24x128xf32>
    %c0_4 = arith.constant 0 : index
    %c0_5 = arith.constant 0 : index
    %8 = vector.load %arg3[%c0_4, %c0_5] : memref<16x128xf32, #tpu.memory_space<vmem>>, vector<16x128xf32>
    %9 = vector.shape_cast %8 : vector<16x128xf32> to vector<16x1x128xf32>
    %10 = vector.shape_cast %1 : vector<24x1xf32> to vector<1x24x1xf32>
    %11 = vector.broadcast %9 : vector<16x1x128xf32> to vector<16x24x128xf32>
    %12 = vector.broadcast %10 : vector<1x24x1xf32> to vector<16x24x128xf32>
    %13 = arith.mulf %11, %12 : vector<16x24x128xf32>
    %14 = arith.addf %7, %13 : vector<16x24x128xf32>
    %15 = vector.shape_cast %14 : vector<16x24x128xf32> to vector<384x128xf32>
    %c0_6 = arith.constant 0 : index
    %c0_7 = arith.constant 0 : index
    %16 = vector.load %arg0[%c0_6, %c0_7] : memref<8x384xf32, #tpu.memory_space<vmem>>, vector<8x384xf32>
    %cst = arith.constant dense<0.000000e+00> : vector<8x128xf32>
    %17 = tpu.matmul %16, %15, %cst {dimension_numbers = #tpu.dot_dimension_numbers<[1], [0], [0], [1], [0, 0, 1, 1], [], []>} : vector<8x384xf32>, vector<384x128xf32>, vector<8x128xf32> -> vector<8x128xf32>
    %c0_8 = arith.constant 0 : index
    %c0_9 = arith.constant 0 : index
    %18 = vector.load %arg4[%c0_8, %c0_9] : memref<1x128xf32, #tpu.memory_space<vmem>>, vector<1x128xf32>
    %19 = vector.broadcast %18 : vector<1x128xf32> to vector<8x128xf32>
    %20 = arith.addf %17, %19 : vector<8x128xf32>
    %cst_10 = arith.constant 0.000000e+00 : f32
    %21 = vector.broadcast %cst_10 : f32 to vector<8x128xf32>
    %22 = arith.maximumf %20, %21 : vector<8x128xf32>
    %c0_11 = arith.constant 0 : index
    %c0_12 = arith.constant 0 : index
    %23 = vector.load %arg5[%c0_11, %c0_12] : memref<8x8xf32, #tpu.memory_space<vmem>>, vector<8x8xf32>
    %cst_13 = arith.constant dense<0.000000e+00> : vector<8x128xf32>
    %24 = tpu.matmul %23, %22, %cst_13 {dimension_numbers = #tpu.dot_dimension_numbers<[1], [0], [0], [1], [0, 0, 1, 1], [], []>} : vector<8x8xf32>, vector<8x128xf32>, vector<8x128xf32> -> vector<8x128xf32>
    %c0_14 = arith.constant 0 : index
    %c0_15 = arith.constant 0 : index
    %25 = vector.load %arg6[%c0_14, %c0_15] : memref<8x1xf32, #tpu.memory_space<vmem>>, vector<8x1xf32>
    %c0_16 = arith.constant 0 : index
    %c0_17 = arith.constant 0 : index
    %26 = vector.load %arg7[%c0_16, %c0_17] : memref<1x256xf32, #tpu.memory_space<vmem>>, vector<1x256xf32>
    %27 = vector.broadcast %25 : vector<8x1xf32> to vector<8x256xf32>
    %28 = vector.broadcast %26 : vector<1x256xf32> to vector<8x256xf32>
    %29 = arith.mulf %27, %28 : vector<8x256xf32>
    %c0_18 = arith.constant 0 : index
    %c0_19 = arith.constant 0 : index
    %30 = vector.load %arg8[%c0_18, %c0_19] : memref<1x256xf32, #tpu.memory_space<vmem>>, vector<1x256xf32>
    %31 = vector.broadcast %30 : vector<1x256xf32> to vector<8x256xf32>
    %32 = arith.addf %29, %31 : vector<8x256xf32>
    %cst_20 = arith.constant 0.000000e+00 : f32
    %33 = vector.broadcast %cst_20 : f32 to vector<8x256xf32>
    %34 = arith.maximumf %32, %33 : vector<8x256xf32>
    %c0_21 = arith.constant 0 : index
    %c0_22 = arith.constant 0 : index
    %35 = vector.load %arg9[%c0_21, %c0_22] : memref<256x128xf32, #tpu.memory_space<vmem>>, vector<256x128xf32>
    %cst_23 = arith.constant dense<0.000000e+00> : vector<8x128xf32>
    %36 = tpu.matmul %34, %35, %cst_23 {dimension_numbers = #tpu.dot_dimension_numbers<[1], [0], [0], [1], [0, 0, 1, 1], [], []>} : vector<8x256xf32>, vector<256x128xf32>, vector<8x128xf32> -> vector<8x128xf32>
    %c0_24 = arith.constant 0 : index
    %c0_25 = arith.constant 0 : index
    %37 = vector.load %arg10[%c0_24, %c0_25] : memref<1x128xf32, #tpu.memory_space<vmem>>, vector<1x128xf32>
    %38 = vector.broadcast %37 : vector<1x128xf32> to vector<8x128xf32>
    %39 = arith.addf %36, %38 : vector<8x128xf32>
    %40 = arith.mulf %24, %39 : vector<8x128xf32>
    %cst_26 = arith.constant 0.000000e+00 : f32
    %41 = vector.broadcast %cst_26 : f32 to vector<8x128xf32>
    %42 = arith.maximumf %40, %41 : vector<8x128xf32>
    %c0_27 = arith.constant 0 : index
    %c0_28 = arith.constant 0 : index
    %43 = vector.load %arg11[%c0_27, %c0_28] : memref<8x128xf32, #tpu.memory_space<vmem>>, vector<8x128xf32>
    tpu.vector_store %arg11[%c0_27, %c0_28], %42 {strides = array<i32>} : memref<8x128xf32, #tpu.memory_space<vmem>>, vector<8x128xf32>,
    return
  }
}

</mosaic_0001>

<bundles_post_ra>
// kernel: lrp_synthetic_forward.1
= control target key start
LH: loop header
LB: loop body
LE: loop exit
PB: predicated region body
PF: predicated region fallthrough
CT: control target
= control target key end

     0   :  { %v1222_v1 = vmov 1   ;;  %v1223_v2 = vmov 0   ;;  %s1806_s0 = inlined_call_operand.vmem [shape: f32[8,384], index: 0, kind: input, shape index: {}]   ;;  %s1807_s1 = inlined_call_operand.vmem [shape: f32[24,2], index: 1, kind: input, shape index: {}]   ;;  %s1808_s2 = inlined_call_operand.vmem [shape: f32[16,128], index: 2, kind: input, shape index: {}]   ;;  %s1809_s3 = inlined_call_operand.vmem [shape: f32[16,128], index: 3, kind: input, shape index: {}]   ;;  %s1810_s4 = inlined_call_operand.vmem [shape: f32[1,128], index: 4, kind: input, shape index: {}]   ;;  %s1811_s5 = inlined_call_operand.vmem [shape: f32[8,8], index: 5, kind: input, shape index: {}]   ;;  %s1812_s6 = inlined_call_operand.vmem [shape: f32[8,1], index: 6, kind: input, shape index: {}]   ;;  %s1813_s7 = inlined_call_operand.vmem [shape: f32[1,256], index: 7, kind: input, shape index: {}]   ;;  %s1814_s8 = inlined_call_operand.vmem [shape: f32[1,256], index: 8, kind: input, shape index: {}]   ;;  %s1815_s9 = inlined_call_operand.vmem [shape: f32[256,128], index: 9, kind: input, shape index: {}]   ;;  %s1816_s10 = inlined_call_operand.vmem [shape: f32[1,128], index: 10, kind: input, shape index: {}]   ;;  %s1817_s11 = inlined_call_operand.hbm [shape: f32[8,128], index: 11, kind: output, shape index: {}]  }
   0x1   :  { %v40_v0 = vld [vmem:[%s1807_s1 + $0x8] sm:$0xff]  ;;  %1193 = vset.pattern.permute.xlu1 %v1222_v1  ;;  %1192 = vset.pattern.permute.xlu0 %v1223_v2 }
   0x2   :  { %474 = vperm.xlu1 %1193, %v40_v0   ;;  %231 = vperm.xlu0 %1192, %v40_v0  }
   0x3   :  { %16 = vsyncpa [#allocation3], 0  ;;  %v41_v3 = vld [vmem:[%s1807_s1 + $0x10] sm:$0xff]  ;;  %v39_v4 = vld [vmem:[%s1807_s1] sm:$0xff]  ;;  %v1820_v6 = vmov 0.0|0.0   ;;  %vm1225_vm0 = vmmov 0   ;;  %v50_v11 = vlaneseq }
   0x4   :  { %v803_v5 = vld [vmem:[%s1812_s6] sm:$0xff]  ;;  %1129 = vmatprep.subr.bf16.mxu1 %v1820_v6  ;;  %v578_v7 = vld [vmem:[%s1806_s0 + $0x8] sm:$0xff]  ;;  %v1818_v8 = vmov 0.0   ;;  %v1227_v9 = vmov 1966171168   ;;  %vm729_vm1 = vcmask 64512  }
   0x5   :  { %651 = vmatprep.mubr.f32.mxu0 %v578_v7  ;;  %1089 = vmatprep.mubr.msk.f32.mxu1 %vm1225_vm0, %v1818_v8  ;;  %v48_v10 = vunpack.c.l.s4 %v1227_v9  ;;  %v51_v13 = vshrl.u32 %v50_v11, 7  ;;  %v42_v14 = vld [vmem:[%s1808_s2] sm:$0xff]  ;;  %v43_v19 = vld [vmem:[%s1808_s2 + $0x8] sm:$0xff] }
   0x6   :  { %478 = vperm.xlu1 %1193, %v41_v3   ;;  %236 = vperm.xlu0 %1192, %v41_v3   ;;  %v287_v15 = vld [vmem:[%s1809_s3] sm:$0xff]  ;;  %v46_v16 = vcombine.high %v42_v14, %v42_v14  ;;  %v288_v23 = vld [vmem:[%s1809_s3 + $0x8] sm:$0xff]  ;;  %v95_v24 = vcombine.high %v43_v19, %v43_v19 }
   0x7   :  { %v49_v12 = vunpack.c.0.s8 %v48_v10  ;;  %v291_v18 = vcombine.high %v287_v15, %v287_v15  ;;  %v340_v28 = vcombine.high %v288_v23, %v288_v23  ;;  %v817_v31 = vsub.s32 1, %v51_v13  ;;  %v1332_v34 = vld [vmem:[%s1813_s7] sm:$0x3] }
   0x8   :  { %v1327_v33 = vsub.s32 0, %v51_v13  ;;  %1829 = vst [vmem:[#allocation6_spill] sm:$0xff] %v1332_v34  ;;  %v1337_v35 = vld [vmem:[%s1814_s8] sm:$0x3] }
   0x9   :  { %v1313_v17 = vsub.s32 %v49_v12, %v51_v13  ;;  %1830 = vst [vmem:[#allocation7_spill] sm:$0xff] %v1337_v35  ;;  %v1351_v47 = vrot.slane %v1332_v34, %v817_v31  ;;  %v1354_v48 = vrot.slane %v1337_v35, %v817_v31 }
   0xa   :  { %470 = vperm.xlu1 %1193, %v39_v4   ;;  %226 = vperm.xlu0 %1192, %v39_v4   ;;  %1828 = vst [vmem:[#allocation5_spill] sm:$0xff] %v1327_v33 }
   0xb   :  { %v60_v20 = vrot.slane %v46_v16, %v1313_v17  ;;  %v102_v21 = vrot.slane %v43_v19, %v1313_v17  ;;  %v305_v22 = vrot.slane %v291_v18, %v1313_v17  ;;  %v347_v25 = vrot.slane %v288_v23, %v1313_v17  ;;  %1831 = vst [vmem:[#allocation8_spill] sm:$0xff] %v1351_v47 }
   0xc   :  { %v53_v30 = vrot.slane %v42_v14, %v1313_v17  ;;  %v298_v32 = vrot.slane %v287_v15, %v1313_v17  ;;  %v109_v38 = vrot.slane %v95_v24, %v1313_v17  ;;  %v354_v42 = vrot.slane %v340_v28, %v1313_v17  ;;  %1832 = vst [vmem:[#allocation9_spill] sm:$0xff] %v1354_v48 }
   0xd   :  { %v62_v26 = vcombine.high %v60_v20, %v60_v20  ;;  %v110_v27 = vcombine.high %v102_v21, %v102_v21  ;;  %v307_v29 = vcombine.high %v305_v22, %v305_v22  ;;  %v355_v37 = vcombine.high %v347_v25, %v347_v25 }
   0xe   :  { %807 = vperm.xlu0 %1192, %v803_v5   ;;  %v69_v36 = vrot.slane %v53_v30, %v1313_v17  ;;  %v118_v40 = vrot.slane %v102_v21, %v1313_v17  ;;  %v61_v44 = vcombine.high %v53_v30, %v53_v30  ;;  %v363_v45 = vrot.slane %v347_v25, %v1313_v17 }
   0xf   :  { %v90_v39 = vrot.slane %v62_v26, %v1313_v17  ;;  %v132_v41 = vrot.slane %v110_v27, %v1313_v17  ;;  %v335_v43 = vrot.slane %v307_v29, %v1313_v17  ;;  %v1348_v46 = vrot.slane %v60_v20, %v1313_v17 }
  0x10   :  { %v306_v49 = vcombine.high %v298_v32, %v298_v32  ;;  %v314_v50 = vrot.slane %v298_v32, %v1313_v17  ;;  %v91_v51 = vcombine.high %v69_v36, %v69_v36  ;;  %v1358_v52 = vrot.slane %v69_v36, %v1327_v33 }
  0x11   :  { %v377_v53 = vrot.slane %v355_v37, %v1313_v17  ;;  %v321_v54 = vrot.slane %v305_v22, %v1313_v17  ;;  %v94_v55 = vcombine.high %v90_v39, %v90_v39  ;;  %v1363_v56 = vrot.slane %v90_v39, %v1327_v33 }
  0x12   :  { %v140_v57 = vcombine.high %v118_v40, %v118_v40  ;;  %v142_v58 = vcombine.high %v132_v41, %v132_v41  ;;  %v339_v59 = vcombine.high %v335_v43, %v335_v43  ;;  %v1366_v60 = vrot.slane %v335_v43, %v1327_v33 }
  0x13   :  { %1833 = vst [vmem:[#allocation10_spill] sm:$0xff] %v1363_v56  ;;  %v385_v61 = vcombine.high %v363_v45, %v363_v45  ;;  %v92_v62 = vcombine.high %v1348_v46, %v1348_v46  ;;  %v83_v63 = vrot.slane %v61_v44, %v1313_v17  ;;  %v328_v0 = vrot.slane %v306_v49, %v1313_v17 }
  0x14   :  { %1834 = vst [vmem:[#allocation11_spill] sm:$0xff] %v1366_v60  ;;  %v111_v1 = vcombine.high %v109_v38, %v109_v38  ;;  %v356_v2 = vcombine.high %v354_v42, %v354_v42  ;;  %v336_v3 = vcombine.high %v314_v50, %v314_v50  ;;  %v1373_v4 = vrot.slane %v314_v50, %v1327_v33 }
  0x15   :  { %v387_v5 = vcombine.high %v377_v53, %v377_v53  ;;  %v337_v7 = vcombine.high %v321_v54, %v321_v54  ;;  %v1376_v9 = vrot.slane %v140_v57, %v1327_v33  ;;  %v1379_v10 = vrot.slane %v142_v58, %v1327_v33 }
  0x16   :  { %v1382_v11 = vrot.slane %v83_v63, %v1327_v33  ;;  %v1385_v12 = vrot.slane %v328_v0, %v1327_v33  ;;  %v1388_v13 = vrot.slane %v385_v61, %v1327_v33  ;;  %v1391_v14 = vrot.slane %v92_v62, %v1327_v33 }
  0x17   :  { %v125_v15 = vrot.slane %v109_v38, %v1313_v17  ;;  %v370_v16 = vrot.slane %v354_v42, %v1313_v17  ;;  %v139_v18 = vrot.slane %v111_v1, %v1313_v17  ;;  %v384_v19 = vrot.slane %v356_v2, %v1313_v17 }
  0x18   :  { %v93_v20 = vcombine.high %v83_v63, %v83_v63  ;;  %v338_v21 = vcombine.high %v328_v0, %v328_v0  ;;  %v436_v22 = vrot.slane %v387_v5, %v1327_v33  ;;  %v1399_v23 = vrot.slane %v337_v7, %v1327_v33 }
  0x19   :  { %v1402_v24 = vrot.slane %v94_v55, %v1327_v33  ;;  %v1405_v25 = vrot.slane %v339_v59, %v1327_v33  ;;  %v1408_v26 = vrot.slane %v125_v15, %v1327_v33  ;;  %v1411_v27 = vrot.slane %v91_v51, %v1327_v33 }
  0x1a   :  { %v1414_v17 = vrot.slane %v336_v3, %v1327_v33  ;;  %v1417_v28 = vrot.slane %v118_v40, %v1327_v33  ;;  %v1420_v29 = vrot.slane %v370_v16, %v1327_v33  ;;  %v1423_v30 = vrot.slane %v363_v45, %v1327_v33 }
  0x1b   :  { %v141_v31 = vcombine.high %v125_v15, %v125_v15  ;;  %v386_v32 = vcombine.high %v370_v16, %v370_v16  ;;  %v1426_v36 = vrot.slane %v93_v20, %v1327_v33  ;;  %v1429_v37 = vrot.slane %v338_v21, %v1327_v33 }
  0x1c   :  { %v143_v38 = vcombine.high %v139_v18, %v139_v18  ;;  %v388_v39 = vcombine.high %v384_v19, %v384_v19  ;;  %v1436_v43 = vrot.slane %v139_v18, %v1327_v33  ;;  %v1439_v44 = vrot.slane %v384_v19, %v1327_v33 }
  0x1d   :  { %v1442_v45 = vrot.slane %v132_v41, %v1327_v33  ;;  %v1445_v49 = vrot.slane %v377_v53, %v1327_v33  ;;  %v1460_v53 = vrot.slane %v141_v31, %v1327_v33  ;;  %v1463_v59 = vrot.slane %v386_v32, %v1327_v33 }
  0x1e   :  { %v1467_v61 = vrot.slane %v1348_v46, %v1327_v33  ;;  %v1470_v62 = vrot.slane %v321_v54, %v1327_v33  ;;  %v1473_v63 = vrot.slane %v143_v38, %v1327_v33  ;;  %v1476_v0 = vrot.slane %v388_v39, %v1327_v33 }
  0x81   :  { %v1431_v42 = vpop.permute.xlu1 %474  ;;  %v1433_v40 = vpop.permute.xlu0 %231 }
  0x82   :  { %v255_v50 = vmul.f32 %v1433_v40, %v1363_v56  ;;  %v497_v51 = vmul.f32 %v1431_v42, %v1366_v60  ;;  %v240_v55 = vmul.f32 %v1433_v40, %v1358_v52  ;;  %v482_v57 = vmul.f32 %v1431_v42, %v1373_v4 }
  0x83   :  { %v258_v58 = vmul.f32 %v1433_v40, %v1391_v14  ;;  %v500_v41 = vmul.f32 %v1431_v42, %v1399_v23  ;;  %v273_v7 = vmul.f32 %v1433_v40, %v1379_v10  ;;  %v515_v46 = vmul.f32 %v1431_v42, %v436_v22 }
  0x84   :  { %v545_v3 = vadd.f32 %v497_v51, %v255_v50  ;;  %v530_v5 = vadd.f32 %v482_v57, %v240_v55  ;;  %v243_v21 = vmul.f32 %v1433_v40, %v1382_v11  ;;  %v485_v31 = vmul.f32 %v1431_v42, %v1385_v12 }
  0x85   :  { %v1478_v1 = vpop.permute.xlu1 %478  ;;  %v1480_v2 = vpop.permute.xlu0 %236  ;;  %v548_v19 = vadd.f32 %v500_v41, %v258_v58 }
  0x86   :  { %v256_v54 = vmul.f32 %v1480_v2, %v1363_v56  ;;  %v498_v15 = vmul.f32 %v1478_v1, %v1366_v60  ;;  %v271_v16 = vmul.f32 %v1480_v2, %v1376_v9  ;;  %v513_v18 = vmul.f32 %v1478_v1, %v1388_v13 }
  0x87   :  { %v241_v20 = vmul.f32 %v1480_v2, %v1358_v52  ;;  %v483_v38 = vmul.f32 %v1478_v1, %v1373_v4  ;;  %v274_v39 = vmul.f32 %v1480_v2, %v1379_v10  ;;  %v516_v50 = vmul.f32 %v1478_v1, %v436_v22 }
  0x88   :  { %v546_v32 = vadd.f32 %v498_v15, %v256_v54  ;;  %v561_v57 = vadd.f32 %v513_v18, %v271_v16  ;;  %v259_v58 = vmul.f32 %v1480_v2, %v1391_v14  ;;  %v501_v41 = vmul.f32 %v1478_v1, %v1399_v23 }
  0x89   :  { %v1504_v51 = vpop.permute.xlu1 %470  ;;  %v1506_v55 = vpop.permute.xlu0 %226  ;;  %v244_v54 = vmul.f32 %v1480_v2, %v1382_v11  ;;  %v563_v60 = vadd.f32 %v515_v46, %v273_v7 }
  0x8a   :  { %v1097_v15 = vpack.c.bf16 %v546_v32, %v545_v3  ;;  %v239_v8 = vmul.f32 %v1506_v55, %v1358_v52  ;;  %v481_v6 = vmul.f32 %v1504_v51, %v1373_v4  ;;  %v272_v35 = vmul.f32 %v1506_v55, %v1379_v10 }
  0x8b   :  { %v514_v16 = vmul.f32 %v1504_v51, %v436_v22  ;;  %v257_v18 = vmul.f32 %v1506_v55, %v1391_v14  ;;  %v499_v34 = vmul.f32 %v1504_v51, %v1399_v23  ;;  %v242_v3 = vmul.f32 %v1506_v55, %v1382_v11 }
  0x8c   :  { %1098 = vmatprep.subr.bf16.mxu0 %v1097_v15  ;;  %v529_v32 = vadd.f32 %v481_v6, %v239_v8  ;;  %v484_v52 = vmul.f32 %v1504_v51, %v1385_v12  ;;  %v260_v4 = vmul.f32 %v1506_v55, %v1402_v24  ;;  %v486_v10 = vmul.f32 %v1478_v1, %v1385_v12 }
  0x8d   :  { %v562_v22 = vadd.f32 %v514_v16, %v272_v35  ;;  %v547_v33 = vadd.f32 %v499_v34, %v257_v18  ;;  %v564_v14 = vadd.f32 %v516_v50, %v274_v39  ;;  %v502_v23 = vmul.f32 %v1504_v51, %v1405_v25 }
  0x8e   :  { %v1099_v48 = vpack.c.bf16 %v530_v5, %v529_v32  ;;  %v532_v47 = vadd.f32 %v484_v52, %v242_v3  ;;  %v276_v6 = vmul.f32 %v1433_v40, %v1408_v26  ;;  %v518_v8 = vmul.f32 %v1431_v42, %v1420_v29 }
  0x8f   :  { %v1130_v11 = vpack.c.bf16 %v562_v22, %v561_v57  ;;  %v1101_v15 = vpack.c.bf16 %v548_v19, %v547_v33  ;;  %v550_v56 = vadd.f32 %v502_v23, %v260_v4  ;;  %v531_v12 = vadd.f32 %v483_v38, %v241_v20 }
  0x90   :  { %1100 = vmatpush3.bf16.msra.mxu0 %v1099_v48  ;;  %v549_v35 = vadd.f32 %v501_v41, %v259_v58  ;;  %v533_v34 = vadd.f32 %v485_v31, %v243_v21  ;;  %v534_v39 = vadd.f32 %v486_v10, %v244_v54  ;;  %v1133_v50 = vpack.c.bf16 %v564_v14, %v563_v60 }
  0x91   :  { %1131 = vmatpush3.bf16.msra.mxu1 %v1130_v11  ;;  %1102 = vmatprep.subr.bf16.mxu0 %v1101_v15  ;;  %v275_v5 = vmul.f32 %v1506_v55, %v1408_v26  ;;  %v517_v16 = vmul.f32 %v1504_v51, %v1420_v29  ;;  %v1835_v18 = vmov 0.0|0.0   ;;  %v1103_v57 = vpack.c.bf16 %v532_v47, %v531_v12 }
  0x92   :  { %1132 = vmatprep.subr.bf16.mxu1 %v1835_v18  ;;  %v1105_v33 = vpack.c.bf16 %v550_v56, %v549_v35  ;;  %v1107_v7 = vpack.c.bf16 %v534_v39, %v533_v34  ;;  %v566_v46 = vadd.f32 %v518_v8, %v276_v6  ;;  %v261_v19 = vmul.f32 %v1433_v40, %v1402_v24 }
  0x93   :  { %v565_v48 = vadd.f32 %v517_v16, %v275_v5  ;;  %v262_v20 = vmul.f32 %v1480_v2, %v1402_v24  ;;  %v503_v60 = vmul.f32 %v1431_v42, %v1405_v25  ;;  %v504_v21 = vmul.f32 %v1478_v1, %v1405_v25 }
  0x94   :  { %1104 = vmatpush3.bf16.msra.mxu0 %v1103_v57  ;;  %v245_v47 = vmul.f32 %v1506_v55, %v1411_v27  ;;  %v246_v56 = vmul.f32 %v1433_v40, %v1411_v27  ;;  %v487_v31 = vmul.f32 %v1504_v51, %v1414_v17  ;;  %v488_v58 = vmul.f32 %v1431_v42, %v1414_v17 }
  0x95   :  { %1134 = vmatpush3.bf16.msra.mxu1 %v1133_v50  ;;  %1106 = vmatprep.subr.bf16.mxu0 %v1105_v33  ;;  %v1136_v38 = vpack.c.bf16 %v566_v46, %v565_v48  ;;  %v551_v24 = vadd.f32 %v503_v60, %v261_v19  ;;  %v552_v41 = vadd.f32 %v504_v21, %v262_v20 }
  0x96   :  { %1135 = vmatprep.subr.bf16.mxu1 %v1835_v18  ;;  %v535_v25 = vadd.f32 %v487_v31, %v245_v47  ;;  %v277_v54 = vmul.f32 %v1480_v2, %v1408_v26  ;;  %v278_v3 = vmul.f32 %v1506_v55, %v1436_v43  ;;  %v536_v32 = vadd.f32 %v488_v58, %v246_v56 }
  0x97   :  { %v519_v52 = vmul.f32 %v1478_v1, %v1420_v29  ;;  %v520_v4 = vmul.f32 %v1504_v51, %v1439_v44  ;;  %v263_v10 = vmul.f32 %v1506_v55, %v1417_v28  ;;  %v1109_v22 = vpack.c.bf16 %v552_v41, %v551_v24 }
  0x98   :  { %1108 = vmatpush3.bf16.msra.mxu0 %v1107_v7  ;;  %v264_v14 = vmul.f32 %v1433_v40, %v1417_v28  ;;  %v505_v26 = vmul.f32 %v1504_v51, %v1423_v30  ;;  %v506_v23 = vmul.f32 %v1431_v42, %v1423_v30  ;;  %v1111_v6 = vpack.c.bf16 %v536_v32, %v535_v25 }
  0x99   :  { %1137 = vmatpush3.bf16.msra.mxu1 %v1136_v38  ;;  %v567_v29 = vadd.f32 %v519_v52, %v277_v54  ;;  %v568_v8 = vadd.f32 %v520_v4, %v278_v3  ;;  %v247_v11 = vmul.f32 %v1480_v2, %v1411_v27  ;;  %1110 = vmatprep.subr.bf16.mxu0 %v1109_v22 }
  0x9a   :  { %1138 = vmatprep.subr.bf16.mxu1 %v1835_v18  ;;  %v553_v15 = vadd.f32 %v505_v26, %v263_v10  ;;  %v554_v12 = vadd.f32 %v506_v23, %v264_v14  ;;  %v248_v35 = vmul.f32 %v1506_v55, %v1426_v36  ;;  %v489_v39 = vmul.f32 %v1478_v1, %v1414_v17 }
  0x9b   :  { %v1139_v34 = vpack.c.bf16 %v568_v8, %v567_v29  ;;  %v490_v50 = vmul.f32 %v1504_v51, %v1429_v37  ;;  %v279_v5 = vmul.f32 %v1433_v40, %v1436_v43  ;;  %v280_v16 = vmul.f32 %v1480_v2, %v1436_v43 }
  0x9c   :  { %1112 = vmatpush3.bf16.msra.mxu0 %v1111_v6  ;;  %v1113_v27 = vpack.c.bf16 %v554_v12, %v553_v15  ;;  %v521_v57 = vmul.f32 %v1431_v42, %v1439_v44  ;;  %v522_v33 = vmul.f32 %v1478_v1, %v1439_v44  ;;  %v537_v7 = vadd.f32 %v489_v39, %v247_v11 }
  0x9d   :  { %1140 = vmatpush3.bf16.msra.mxu1 %v1139_v34  ;;  %v538_v17 = vadd.f32 %v490_v50, %v248_v35  ;;  %v265_v46 = vmul.f32 %v1480_v2, %v1417_v28  ;;  %v266_v48 = vmul.f32 %v1506_v55, %v1442_v45  ;;  %v507_v20 = vmul.f32 %v1478_v1, %v1423_v30 }
  0x9e   :  { %1114 = vmatprep.subr.bf16.mxu0 %v1113_v27  ;;  %1141 = vmatprep.subr.bf16.mxu1 %v1835_v18  ;;  %v569_v19 = vadd.f32 %v521_v57, %v279_v5  ;;  %v570_v43 = vadd.f32 %v522_v33, %v280_v16  ;;  %v508_v44 = vmul.f32 %v1504_v51, %v1445_v49  ;;  %v1650_v16 = vpop.permute.xlu0 %807 }
  0x9f   :  { %v1115_v60 = vpack.c.bf16 %v538_v17, %v537_v7  ;;  %v249_v21 = vmul.f32 %v1433_v40, %v1426_v36  ;;  %v250_v28 = vmul.f32 %v1480_v2, %v1426_v36  ;;  %v555_v56 = vadd.f32 %v507_v20, %v265_v46 }
  0xa0   :  { %v1142_v47 = vpack.c.bf16 %v570_v43, %v569_v19  ;;  %v491_v31 = vmul.f32 %v1431_v42, %v1429_v37  ;;  %v492_v38 = vmul.f32 %v1478_v1, %v1429_v37  ;;  %v556_v30 = vadd.f32 %v508_v44, %v266_v48  ;;  %v1836_v48 = vld [vmem:[#allocation10_spill] sm:$0xff] }
  0xa1   :  { %1116 = vmatpush3.bf16.msra.mxu0 %v1115_v60  ;;  %v281_v24 = vmul.f32 %v1506_v55, %v1460_v53  ;;  %v282_v58 = vmul.f32 %v1433_v40, %v1460_v53  ;;  %v523_v41 = vmul.f32 %v1504_v51, %v1463_v59  ;;  %v524_v54 = vmul.f32 %v1431_v42, %v1463_v59  ;;  %v1837_v60 = vld [vmem:[#allocation11_spill] sm:$0xff] }
  0xa2   :  { %1143 = vmatpush3.bf16.msra.mxu1 %v1142_v47  ;;  %v539_v36 = vadd.f32 %v491_v31, %v249_v21  ;;  %v540_v25 = vadd.f32 %v492_v38, %v250_v28  ;;  %v267_v37 = vmul.f32 %v1433_v40, %v1442_v45  ;;  %v1117_v3 = vpack.c.bf16 %v556_v30, %v555_v56  ;;  %v1838_v21 = vld [vmem:[#allocation8_spill] sm:$0xff]  ;;  %v1839_v30 = vld [vmem:[#allocation9_spill] sm:$0xff] }
  0xa3   :  { %1144 = vmatprep.subr.bf16.mxu1 %v1835_v18  ;;  %v571_v32 = vadd.f32 %v523_v41, %v281_v24  ;;  %v268_v52 = vmul.f32 %v1480_v2, %v1442_v45  ;;  %v509_v4 = vmul.f32 %v1431_v42, %v1445_v49  ;;  %v572_v22 = vadd.f32 %v524_v54, %v282_v58  ;;  %v855_v47 = vld [vmem:[%s1815_s9 + $0x80] sm:$0xff]  ;;  %v858_v41 = vld [vmem:[%s1815_s9 + $0x98] sm:$0xff] }
  0xa4   :  { %v1119_v10 = vpack.c.bf16 %v540_v25, %v539_v36  ;;  %v510_v14 = vmul.f32 %v1478_v1, %v1445_v49  ;;  %v251_v26 = vmul.f32 %v1506_v55, %v1467_v61  ;;  %1118 = vmatprep.subr.bf16.mxu0 %v1117_v3  ;;  %v252_v6 = vmul.f32 %v1433_v40, %v1467_v61  ;;  %v577_v36 = vld [vmem:[%s1806_s0] sm:$0xff]  ;;  %v579_v25 = vld [vmem:[%s1806_s0 + $0x10] sm:$0xff] }
  0xa5   :  { %v557_v23 = vadd.f32 %v509_v4, %v267_v37  ;;  %v493_v29 = vmul.f32 %v1504_v51, %v1470_v62  ;;  %v494_v45 = vmul.f32 %v1431_v42, %v1470_v62  ;;  %v1145_v8 = vpack.c.bf16 %v572_v22, %v571_v32  ;;  %v841_v32 = vld [vmem:[%s1815_s9 + $0x10] sm:$0xff]  ;;  %v860_v22 = vld [vmem:[%s1815_s9 + $0xa8] sm:$0xff] }
  0xa6   :  { %1120 = vmatpush3.bf16.msra.mxu0 %v1119_v10  ;;  %v558_v11 = vadd.f32 %v510_v14, %v268_v52  ;;  %v283_v49 = vmul.f32 %v1480_v2, %v1460_v53  ;;  %v284_v15 = vmul.f32 %v1506_v55, %v1473_v63  ;;  %v525_v34 = vmul.f32 %v1478_v1, %v1463_v59  ;;  %v842_v52 = vld [vmem:[%s1815_s9 + $0x18] sm:$0xff]  ;;  %v859_v10 = vld [vmem:[%s1815_s9 + $0xa0] sm:$0xff] }
  0xa7   :  { %v541_v12 = vadd.f32 %v493_v29, %v251_v26  ;;  %v542_v35 = vadd.f32 %v494_v45, %v252_v6  ;;  %v526_v39 = vmul.f32 %v1504_v51, %v1476_v0  ;;  %1146 = vmatpush3.bf16.msra.mxu1 %v1145_v8  ;;  %v269_v5 = vmul.f32 %v1506_v55, %v1376_v9  ;;  %v844_v6 = vld [vmem:[%s1815_s9 + $0x28] sm:$0xff]  ;;  %v861_v29 = vld [vmem:[%s1815_s9 + $0xb0] sm:$0xff]  ;;  %v862_v45 = vld [vmem:[%s1815_s9 + $0xb8] sm:$0xff] }
  0xa8   :  { %v1121_v50 = vpack.c.bf16 %v558_v11, %v557_v23  ;;  %v270_v27 = vmul.f32 %v1433_v40, %v1376_v9  ;;  %v511_v53 = vmul.f32 %v1504_v51, %v1388_v13  ;;  %1147 = vmatprep.subr.bf16.mxu1 %v1835_v18  ;;  %v573_v59 = vadd.f32 %v525_v34, %v283_v49  ;;  %v843_v23 = vld [vmem:[%s1815_s9 + $0x20] sm:$0xff]  ;;  %v845_v49 = vld [vmem:[%s1815_s9 + $0x30] sm:$0xff] }
  0xa9   :  { %v1123_v57 = vpack.c.bf16 %v542_v35, %v541_v12  ;;  %v574_v33 = vadd.f32 %v526_v39, %v284_v15  ;;  %v512_v7 = vmul.f32 %v1431_v42, %v1388_v13  ;;  %v253_v46 = vmul.f32 %v1480_v2, %v1467_v61  ;;  %v846_v15 = vld [vmem:[%s1815_s9 + $0x38] sm:$0xff]  ;;  %v863_v12 = vld [vmem:[%s1815_s9 + $0xc0] sm:$0xff]  ;;  %v864_v35 = vld [vmem:[%s1815_s9 + $0xc8] sm:$0xff] }
  0xaa   :  { %1122 = vmatprep.subr.bf16.mxu0 %v1121_v50  ;;  %v559_v17 = vadd.f32 %v511_v53, %v269_v5  ;;  %v254_v9 = vmul.f32 %v1506_v55, %v1836_v48  ;;  %v495_v19 = vmul.f32 %v1478_v1, %v1470_v62  ;;  %v496_v44 = vmul.f32 %v1504_v51, %v1837_v60  ;;  %v847_v50 = vld [vmem:[%s1815_s9 + $0x40] sm:$0xff]  ;;  %v848_v5 = vld [vmem:[%s1815_s9 + $0x48] sm:$0xff]  ;;  %v866_v53 = vld [vmem:[%s1815_s9 + $0xd8] sm:$0xff] }
  0xab   :  { %1124 = vmatpush3.bf16.msra.mxu0 %v1123_v57  ;;  %v1148_v43 = vpack.c.bf16 %v574_v33, %v573_v59  ;;  %v560_v20 = vadd.f32 %v512_v7, %v270_v27  ;;  %v285_v13 = vmul.f32 %v1433_v40, %v1473_v63  ;;  %v822_v28 = vmul.f32 %v1838_v21, %v1650_v16  ;;  %v856_v40 = vld [vmem:[%s1815_s9 + $0x88] sm:$0xff]  ;;  %v865_v27 = vld [vmem:[%s1815_s9 + $0xd0] sm:$0xff]  ;;  %v850_v7 = vld [vmem:[%s1815_s9 + $0x58] sm:$0xff] }
  0xac   :  { %v286_v61 = vmul.f32 %v1480_v2, %v1473_v63  ;;  %v527_v55 = vmul.f32 %v1431_v42, %v1476_v0  ;;  %v528_v62 = vmul.f32 %v1478_v1, %v1476_v0  ;;  %v543_v56 = vadd.f32 %v495_v19, %v253_v46  ;;  %v839_v0 = vld [vmem:[%s1815_s9] sm:$0xff]  ;;  %v840_v1 = vld [vmem:[%s1815_s9 + $0x8] sm:$0xff]  ;;  %v849_v33 = vld [vmem:[%s1815_s9 + $0x50] sm:$0xff] }
  0xad   :  { %1149 = vmatpush3.bf16.msra.mxu1 %v1148_v43  ;;  %v1125_v51 = vpack.c.bf16 %v560_v20, %v559_v17  ;;  %v544_v31 = vadd.f32 %v496_v44, %v254_v9  ;;  %v1153_v38 = vpack.c.bf16 %v856_v40, %v855_v47  ;;  %v836_v24 = vadd.f32 %v1839_v30, %v822_v28  ;;  %v867_v17 = vld [vmem:[%s1815_s9 + $0xe0] sm:$0xff]  ;;  %v868_v46 = vld [vmem:[%s1815_s9 + $0xe8] sm:$0xff]  ;;  %v1842_v19 = vld [vmem:[#allocation6_spill] sm:$0xff] }
  0xae   :  { %1150 = vmatprep.subr.bf16.mxu1 %v1835_v18  ;;  %v575_v63 = vadd.f32 %v527_v55, %v285_v13  ;;  %v576_v2 = vadd.f32 %v528_v62, %v286_v61  ;;  %v857_v18 = vld [vmem:[%s1815_s9 + $0x90] sm:$0xff]  ;;  %v1155_v54 = vpack.c.bf16 %v840_v1, %v839_v0  ;;  %v1840_v37 = vmov 0.0   ;;  %v1841_v9 = vld [vmem:[#allocation5_spill] sm:$0xff]  ;;  %v851_v60 = vld [vmem:[%s1815_s9 + $0x60] sm:$0xff] }
  0xaf   :  { %1126 = vmatprep.subr.bf16.mxu0 %v1125_v51  ;;  %v1127_v42 = vpack.c.bf16 %v544_v31, %v543_v56  ;;  %v1157_v3 = vpack.c.bf16 %v858_v41, %v857_v18  ;;  %v838_v4 = vmax.f32 %v836_v24, 0.0  ;;  %v1159_v14 = vpack.c.bf16 %v842_v52, %v841_v32  ;;  %v852_v44 = vld [vmem:[%s1815_s9 + $0x68] sm:$0xff]  ;;  %v869_v13 = vld [vmem:[%s1815_s9 + $0xf0] sm:$0xff]  ;;  %v870_v21 = vld [vmem:[%s1815_s9 + $0xf8] sm:$0xff] }
  0xb0   :  { %v1151_v58 = vpack.c.bf16 %v576_v2, %v575_v63  ;;  %v1161_v26 = vpack.c.bf16 %v860_v22, %v859_v10  ;;  %v1163_v8 = vpack.c.bf16 %v844_v6, %v843_v23  ;;  %v1165_v11 = vpack.c.bf16 %v862_v45, %v861_v29  ;;  %v1843_v61 = vld [vmem:[#allocation7_spill] sm:$0xff]  ;;  %v853_v40 = vld [vmem:[%s1815_s9 + $0x70] sm:$0xff]  ;;  %v728_v18 = vld [vmem:[%s1811_s5] sm:$0xff] }
  0xb1   :  { %1128 = vmatpush3.bf16.msra.mxu0 %v1127_v42  ;;  %v1167_v34 = vpack.c.bf16 %v846_v15, %v845_v49  ;;  %v1169_v39 = vpack.c.bf16 %v864_v35, %v863_v12  ;;  %v1171_v57 = vpack.c.bf16 %v848_v5, %v847_v50  ;;  %v1173_v59 = vpack.c.bf16 %v866_v53, %v865_v27  ;;  %v854_v51 = vld [vmem:[%s1815_s9 + $0x78] sm:$0xff] }
  0xb2   :  { %1152 = vmatpush3.bf16.msra.mxu1 %v1151_v58  ;;  %1092 = vmatprep.subr.mxu0 %v1840_v37  ;;  %v1175_v48 = vpack.c.bf16 %v850_v7, %v849_v33  ;;  %v814_v43 = vrot.slane %v1842_v19, %v1841_v9  ;;  %v1177_v20 = vpack.c.bf16 %v868_v46, %v867_v17 }
  0xb3   :  { %1154 = vmatprep.subr.bf16.mxu1 %v1153_v38  ;;  %v1179_v28 = vpack.c.bf16 %v852_v44, %v851_v60  ;;  %v828_v55 = vrot.slane %v1843_v61, %v1841_v9  ;;  %v1181_v47 = vpack.c.bf16 %v870_v21, %v869_v13  ;;  %v1183_v56 = vpack.c.bf16 %v854_v51, %v853_v40 }
  0xb4   :  { %652 = vmatmul.mubr.f32.vlgmr.msra.gmra.mrb[0].mxu0 %v577_v36  ;;  %v821_v62 = vmul.f32 %v814_v43, %v1650_v16  ;;  %v965_v16 = vld [vmem:[%s1810_s4] ss:$0 sm:$0xff]  ;;  %s1228_s4 = smov [#allocation2]  }
  0xb5   :  { %1090 = vmatmul.mubr.f32.vlgmr.msra.gmra.mrb[0].mxu1 %v579_v25  ;;  %1094 = vmatprep.mubr.msk.f32.mxu0 %vm1225_vm0, %v1840_v37  ;;  %s957_s2 = sshll.u32 %s1228_s4, 4  ;;  %s958_s2 = int_to_ptr.vmem [resolvable:$true] %s957_s2 }
  0xb6   :  { %1156 = vmatpush3.bf16.msra.mxu1 %v1155_v54  ;;  %942 = vmatprep.mubr.f32.mxu1 %v838_v4  ;;  %v835_v31 = vadd.f32 %v828_v55, %v821_v62  ;;  %v967_v54 = vld [vmem:[%s1816_s10] ss:$0 sm:$0xff]  ;;  %s1198_s5 = scalar_lea.vmem %s958_s2, 128  ;;  %p1203_p1 = scmp.lt.s32.totalorder %s958_s2, %s958_s2 }
  0xb7   :  { %1158 = vmatprep.subr.bf16.mxu1 %v1157_v3  ;;  %p1199_p0 = scmp.ne.s32.totalorder %s958_s2, %s1198_s5  ;;  %p1204_p2 = scmp.lt.s32.totalorder %s1198_s5, %s1198_s5 }
  0xb8   :  { %v837_v63 = vmax.f32 %v835_v31, 0.0 }
  0xb9   :  { %p1205_p3 = por %p1204_p2, %p1203_p1 }
  0xba   :  { %1160 = vmatpush3.bf16.msra.mxu1 %v1159_v14 }
  0xbb   :  { %1162 = vmatprep.subr.bf16.mxu1 %v1161_v26  ;;  %p1206_p4 = pnand %p1205_p3, %p1199_p0 }
  0xbe   :  { %1164 = vmatpush3.bf16.msra.mxu1 %v1163_v8 }
  0xbf   :  { %1166 = vmatprep.subr.bf16.mxu1 %v1165_v11 }
  0xc2   :  { %1168 = vmatpush3.bf16.msra.mxu1 %v1167_v34 }
  0xc3   :  { %1170 = vmatprep.subr.bf16.mxu1 %v1169_v39 }
  0xc6   :  { %1172 = vmatpush3.bf16.msra.mxu1 %v1171_v57 }
  0xc7   :  { %1174 = vmatprep.subr.bf16.mxu1 %v1173_v59 }
  0xca   :  { %1176 = vmatpush3.bf16.msra.mxu1 %v1175_v48 }
  0xcb   :  { %1178 = vmatprep.subr.bf16.mxu1 %v1177_v20 }
  0xce   :  { %1180 = vmatpush3.bf16.msra.mxu1 %v1179_v28 }
  0xcf   :  { %1182 = vmatprep.subr.bf16.mxu1 %v1181_v47 }
  0xd2   :  { %1184 = vmatpush3.bf16.msra.mxu1 %v1183_v56 }
  0xd5   :  { %943 = vmatmul.mubr.f32.vlgmr.msra.gmra.mrb[2].mxu1 %v837_v63 }
 0x187   :  { %v1000_v2 = vpop.f32.mrb[0].mxu0 }
 0x188   :  { %v1001_v42 = vpop.f32.mrb[1].mxu0  ;;  %v723_v38 = vpop.f32.mrb[0].mxu1 }
 0x189   :  { %v1002_v0 = vadd.f32 %v1001_v42, %v1000_v2  ;;  %v1091_v1 = vpop.f32.mrb[1].mxu1 }
 0x18b   :  { %v654_v30 = vadd.f32 %v1002_v0, %v965_v16 }
 0x18d   :  { %v724_v24 = vadd.f32 %v723_v38, %v654_v30 }
 0x18f   :  { %v727_v58 = vmax.f32 %v724_v24, 0.0 }
 0x191   :  { %1093 = vmatpush3.msra.mxu0 %v727_v58 }
 0x192   :  { %1095 = vmatmul.mubr.msk.f32.vlgmr.msra.gmra.mrb[2].mxu0 %vm729_vm1, %v728_v18 }
 0x1a8   :  { %v1054_v41 = vpop.f32.mrb[2].mxu1 }
 0x1a9   :  { %v1055_v36 = vpop.f32.mrb[3].mxu1 }
 0x1aa   :  { %v1056_v25 = vadd.f32 %v1055_v36, %v1054_v41 }
 0x1ac   :  { %v945_v37 = vadd.f32 %v1056_v25, %v967_v54 }
 0x265   :  { %v799_v3 = vpop.f32.mrb[2].mxu0 }
 0x266   :  { %v948_v32 = vmul.f32 %v945_v37, %v799_v3  ;;  %v1096_v52 = vpop.f32.mrb[3].mxu0 }
 0x268   :  { %v949_v4 = vmax.f32 %v948_v32, 0.0 }
 0x26a   :  { %950 = vst [vmem:[#allocation2] sm:$0xff] %v949_v4 }
 0x26b   :  { %1209 = shalt.err (!%p1206_p4)
}
 0x26c   :  { %s1210_s10 = scalar_lea.hbm %s1817_s11, 128 }
 0x26d   :  { %p1211_p5 = scmp.ne.s32.totalorder %s1817_s11, %s1210_s10  ;;  %p1214_p6 = scmp.lt.u32.totalorder %s1210_s10, %s1817_s11 }
 0x26f   :  { %p1216_p7 = pnand %p1214_p6, %p1211_p5 }
 0x271   :  { %1219 = shalt.err (!%p1216_p7)
}
 0x272   :  { %960 = dma.vmem_to_hbm [thread:$0]  %s958_s2, 128, %s1817_s11, [#allocation3]  }
 0x273   :  { %1220 = dma.done.wait [#allocation3], 128  }
 0x274   :  { %1221 = vsyncadd [#allocation3], 4294967168 }
 0x275   :  { %964 = vsyncpa [#allocation3], 1 }

</bundles_post_ra>
